<compile_context>
chip_gen: v7x
topology: tpu7x:2x2x1
jax: 0.10.0
libtpu: 0.0.40
codegen_flags: <defaults>
</compile_context>

<pallas_src>
import numpy as np
import jax
import jax.numpy as jnp
from jax import lax
from jax.experimental import pallas as pl
from jax.experimental.pallas import tpu as pltpu

_LANE = 128


def _flip_tile_kernel(x_ref, perm_ref, o_ref):
    """Reverse the lanes of a (tr, 128*k) tile.

    The column-tile order across W is already reversed by the input index_map;
    here we reverse within the tile: each 128-lane chunk is reversed with a
    128x128 anti-diagonal (one MXU pass) and stored at the mirrored chunk slot.
    """
    ct = x_ref.shape[-1]
    nsub = ct // _LANE                      # static (1, 2 or 4)
    perm = perm_ref[...]                    # 128x128 anti-diagonal, f32
    for s in range(nsub):                   # static unroll, <= 4
        blk = x_ref[:, s * _LANE:(s + 1) * _LANE].astype(jnp.float32)
        rev = lax.dot_general(
            blk, perm,
            dimension_numbers=(((1,), (0,)), ((), ())),
            precision=lax.Precision.HIGHEST,          # exact x * {0,1}
            preferred_element_type=jnp.float32)
        d = nsub - 1 - s
        o_ref[:, d * _LANE:(d + 1) * _LANE] = rev.astype(o_ref.dtype)


def _f32_roundtrip_exact(dtype) -> bool:
    dtype = jnp.dtype(dtype)
    if dtype in (jnp.dtype(jnp.float32), jnp.dtype(jnp.bfloat16), jnp.dtype(jnp.float16)):
        return True
    if jnp.issubdtype(dtype, jnp.integer) and dtype.itemsize <= 2:
        return True
    return False


def _pick_col_tile(W: int):
    for cand in (512, 256, 128):            # biggest lane-dense tile that divides W
        if W >= cand and W % cand == 0:
            return cand
    return None


def horizontal_flip_image(img, *, row_tile=1024):
    """Flip an NCHW image left-right (along W), in its native dtype."""
    B, C, H, W = img.shape
    R = B * C * H
    dtype = img.dtype

    ct = _pick_col_tile(W)
    if ct is None or not _f32_roundtrip_exact(dtype):
        # Lane-sparse widths (W < 128 or W % 128 != 0) would force masked
        # partial stores / padded DMA, and >16-bit integer dtypes are not exact
        # through the f32 dot.  XLA's rev is already ~HBM roofline here.
        return jnp.flip(img, axis=-1)

    nCT = W // ct

    # Row tile: respect the VMEM budget (row_tile cap) and make sure the grid
    # has >= 4 steps so both v7x TensorCores get work under "parallel".
    min_steps = 4
    row_blocks = max(pl.cdiv(R, row_tile), pl.cdiv(min_steps, nCT))
    tr = pl.cdiv(R, row_blocks)
    tr = max(8, pl.cdiv(tr, 8) * 8) if R >= 8 else R   # sublane-aligned (or full dim)

    x = img.reshape(R, W)
    # Fixed 128x128 anti-diagonal permutation: perm[k, u] = 1 iff k == 127 - u.
    # 64 KiB, constant block index -> stays resident in VMEM across grid steps.
    perm = jnp.fliplr(jnp.eye(_LANE, dtype=jnp.float32))

    grid = (pl.cdiv(R, tr), nCT)
    nbytes = R * W * jnp.dtype(dtype).itemsize
    cost = pl.CostEstimate(
        flops=2 * R * W * _LANE,            # one 128-MAC column per element
        transcendentals=0,
        bytes_accessed=2 * nbytes + perm.size * 4,   # bytes dominate -> mem-bound
    )

    out = pl.pallas_call(
        _flip_tile_kernel,
        out_shape=jax.ShapeDtypeStruct((R, W), dtype),
        grid_spec=pltpu.PrefetchScalarGridSpec(
            num_scalar_prefetch=0,
            grid=grid,
            in_specs=[
                # Column-tile order reversed purely via addressing (free).
                pl.BlockSpec((tr, ct), lambda i, j: (i, nCT - 1 - j)),
                pl.BlockSpec((_LANE, _LANE), lambda i, j: (0, 0)),
            ],
            out_specs=pl.BlockSpec((tr, ct), lambda i, j: (i, j)),
        ),
        compiler_params=pltpu.CompilerParams(
            dimension_semantics=("parallel", "parallel"),
        ),
        cost_estimate=cost,
    )(x, perm)
    return out.reshape(B, C, H, W)


def horizontal_flip_points(p, width):
    """p[..., 0] = width - 1 - p[..., 0] (plain JAX; trivial scalar work)."""
    return p.at[..., 0].set(width - 1 - p[..., 0])


class HorizontalFlip:
    """JAX/Pallas equivalent of the PyTorch HorizontalFlip module (NCHW images)."""

    def __init__(self, flip):
        self.flip = bool(flip)   # static Python flag -> no host sync in the hot path

    def __call__(self, img, p):
        if self.flip:
            width = img.shape[-1]
            img = horizontal_flip_image(img)
            p = horizontal_flip_points(p, width)
        return img, p


if __name__ == "__main__":
    key = jax.random.PRNGKey(0)
    k_img, k_pts = jax.random.split(key)

    # W is a multiple of 128 -> exercises the Pallas kernel (grid = (4, 1)).
    B, C, H, W = 2, 4, 16, 256
    img = jax.random.uniform(k_img, (B, C, H, W), dtype=jnp.float32)
    pts = jax.random.uniform(k_pts, (2, 8, 2), dtype=jnp.float32) * (W - 1)

    mod = HorizontalFlip(flip=True)
    out_img, out_pts = jax.block_until_ready(mod(img, pts))

    ref_img = np.asarray(img)[..., ::-1]
    ref_pts = np.asarray(pts).copy()
    ref_pts[..., 0] = W - 1 - ref_pts[..., 0]
    np.testing.assert_allclose(np.asarray(out_img), ref_img, rtol=1e-6, atol=1e-6)
    np.testing.assert_allclose(np.asarray(out_pts), ref_pts, rtol=1e-6, atol=1e-6)

    # Native-dtype (bf16) path, still through the Pallas kernel (no f32 HBM trip).
    img_bf16 = img.astype(jnp.bfloat16)
    out_bf16, _ = jax.block_until_ready(mod(img_bf16, pts))
    np.testing.assert_allclose(
        np.asarray(out_bf16, dtype=np.float32),
        np.asarray(img_bf16, dtype=np.float32)[..., ::-1],
        rtol=1e-6, atol=1e-6)

    # Lane-sparse width (W = 16) -> jnp.flip fallback path.
    img_small = jax.random.uniform(key, (2, 4, 16, 16), dtype=jnp.float32)
    out_small, _ = jax.block_until_ready(mod(img_small, pts))
    np.testing.assert_allclose(np.asarray(out_small),
                               np.asarray(img_small)[..., ::-1])

    # flip = False path: identity pass-through.
    mod_off = HorizontalFlip(flip=False)
    id_img, id_pts = jax.block_until_ready(mod_off(img, pts))
    np.testing.assert_allclose(np.asarray(id_img), np.asarray(img))
    np.testing.assert_allclose(np.asarray(id_pts), np.asarray(pts))

    print("KERNEL_OK")
</pallas_src>

<mosaic_0001>
module attributes {stable_mosaic.version = 11 : i64} {
  func.func @_flip_tile_kernel(%arg0: i32, %arg1: i32, %arg2: memref<32x256xf32, #tpu.memory_space<vmem>>, %arg3: memref<128x128xf32, #tpu.memory_space<vmem>>, %arg4: memref<32x256xf32, #tpu.memory_space<vmem>>) attributes {dimension_semantics = [#tpu.dimension_semantics<parallel>, #tpu.dimension_semantics<parallel>], iteration_bounds = array<i64: 4, 1>, scalar_prefetch = 0 : i64, scratch_operands = 0 : i64, tpu.core_type = #tpu.core_type<tc>, window_params = [{transform_indices = @transform_0, window_bounds = array<i64: 32, 256>}, {pipeline_mode = #tpu.pipeline_mode<synchronous>, transform_indices = @transform_1, window_bounds = array<i64: 128, 128>}, {transform_indices = @transform_2, window_bounds = array<i64: 32, 256>}]} {
    %c0 = arith.constant 0 : index
    %c0_0 = arith.constant 0 : index
    %0 = vector.load %arg3[%c0, %c0_0] : memref<128x128xf32, #tpu.memory_space<vmem>>, vector<128x128xf32>
    %c0_1 = arith.constant 0 : index
    %c0_2 = arith.constant 0 : index
    %1 = vector.load %arg2[%c0_1, %c0_2] : memref<32x256xf32, #tpu.memory_space<vmem>>, vector<32x128xf32>
    %cst = arith.constant dense<0.000000e+00> : vector<32x128xf32>
    %2 = tpu.matmul %1, %0, %cst {dimension_numbers = #tpu.dot_dimension_numbers<[1], [0], [0], [1], [0, 0, 1, 1], [], []>, precision = #tpu.contract_precision<fp32>} : vector<32x128xf32>, vector<128x128xf32>, vector<32x128xf32> -> vector<32x128xf32>
    %c0_3 = arith.constant 0 : index
    %c128 = arith.constant 128 : index
    %3 = vector.load %arg4[%c0_3, %c128] : memref<32x256xf32, #tpu.memory_space<vmem>>, vector<32x128xf32>
    tpu.vector_store %arg4[%c0_3, %c128], %2 {strides = array<i32>} : memref<32x256xf32, #tpu.memory_space<vmem>>, vector<32x128xf32>,
    %c0_4 = arith.constant 0 : index
    %c128_5 = arith.constant 128 : index
    %4 = vector.load %arg2[%c0_4, %c128_5] : memref<32x256xf32, #tpu.memory_space<vmem>>, vector<32x128xf32>
    %cst_6 = arith.constant dense<0.000000e+00> : vector<32x128xf32>
    %5 = tpu.matmul %4, %0, %cst_6 {dimension_numbers = #tpu.dot_dimension_numbers<[1], [0], [0], [1], [0, 0, 1, 1], [], []>, precision = #tpu.contract_precision<fp32>} : vector<32x128xf32>, vector<128x128xf32>, vector<32x128xf32> -> vector<32x128xf32>
    %c0_7 = arith.constant 0 : index
    %c0_8 = arith.constant 0 : index
    %6 = vector.load %arg4[%c0_7, %c0_8] : memref<32x256xf32, #tpu.memory_space<vmem>>, vector<32x128xf32>
    tpu.vector_store %arg4[%c0_7, %c0_8], %5 {strides = array<i32>} : memref<32x256xf32, #tpu.memory_space<vmem>>, vector<32x128xf32>,
    return
  }
  func.func @transform_0(%arg0: i32, %arg1: i32) -> (i32, i32) {
    %c0_i32 = arith.constant 0 : i32
    %0 = arith.subi %c0_i32, %arg1 : i32
    %c0_i32_0 = arith.constant 0 : i32
    return %arg0, %0 : i32, i32
  }
  func.func @transform_1(%arg0: i32, %arg1: i32) -> (i32, i32) {
    %c0_i32 = arith.constant 0 : i32
    %c0_i32_0 = arith.constant 0 : i32
    %c0_i32_1 = arith.constant 0 : i32
    return %c0_i32, %c0_i32_0 : i32, i32
  }
  func.func @transform_2(%arg0: i32, %arg1: i32) -> (i32, i32) {
    %c0_i32 = arith.constant 0 : i32
    return %arg0, %arg1 : i32, i32
  }
}

</mosaic_0001>

<bundles_post_ra>
// kernel: tpu_custom_call.1
= control target key start
LH: loop header
LB: loop body
LE: loop exit
PB: predicated region body
PF: predicated region fallthrough
CT: control target
= control target key end

     0   :  { %7 = vsyncpa [#allocation3], 0  ;;  %s4017_s0 = inlined_call_operand.hbm [shape: f32[128,256], index: 0, kind: input, shape index: {}]   ;;  %s4018_s1 = inlined_call_operand.hbm [shape: f32[128,128], index: 1, kind: input, shape index: {}]   ;;  %s4019_s2 = inlined_call_operand.hbm [shape: f32[128,256], index: 2, kind: output, shape index: {}]  }
   0x1   :  { %9 = vsyncpa [#allocation3 + $0x1], 0 }
   0x2   :  { %10 = vsyncpa [#allocation6], 0 }
   0x3   :  { %11 = vsyncpa [#allocation4], 0 }
   0x4   :  { %13 = vsyncpa [#allocation4 + $0x1], 0  ;;  %s3282_s9 = smov 0   ;;  %s3284_s10 = smov 0  }
   0x5   :  { %s3286_s11 = smov 0   ;;  %s3288_s12 = smov 0  }
   0x6   :  { %s3290_s13 = smov 0   ;;  %s3292_s14 = smov 0  }
   0x7 LB: > { %s1890_s15 = sadd.s32 4294967295, %s3256_s14   ;;  %s1891_s16 = sadd.s32 4294967294, %s3256_s14   ;;  %s3256_s14 = sphi %s3292_s14, %s19_s14   ;;  %s3252_s13 = sphi %s3290_s13, %s4101_s13   ;;  %s3248_s12 = sphi %s3288_s12, %s4100_s12   ;;  %s3244_s11 = sphi %s3286_s11, %s4099_s11   ;;  %s3240_s10 = sphi %s3284_s10, %s4098_s10   ;;  %s3236_s9 = sphi %s3282_s9, %s4097_s9  }
   0x8   : > { %p55_p0 = scmp.ne.s32.totalorder %s3240_s10, %s3236_s9  ;;  %p3316_p1 = scmp.eq.s32.totalorder %s1890_s15, 0 }
   0x9   : > { %p3320_p2 = scmp.eq.s32.totalorder %s1890_s15, 3  ;;  %p108_p3 = scmp.eq.s32.totalorder %s1891_s16, 3 }
   0xa   : > { %s4053_s17 = scalar_select %p3316_p1, 1, 0 }
   0xb   : > { %s4054_s18 = scalar_select %p3320_p2, 1, 0 }
   0xc   : > { %p3326_p4 = por %p3316_p1, %p55_p0  ;;  %p1892_p5 = scmp.ge.s32.totalorder %s3256_s14, 1 }
   0xd   : > { %p3331_p6 = por %p108_p3, %p55_p0  ;;  %p115_p7 = scmp.lt.s32.totalorder %s3256_s14, 5 }
   0xe   : > { %s4055_s19 = scalar_select %p3326_p4, 1, 0 }
   0xf   : > { %s4056_s20 = scalar_select %p3331_p6, 1, 0 }
  0x10   : > { %p3336_p8 = pnand %p1892_p5, %p115_p7  ;;  %s3258_s22 = smov [#allocation5]  }
  0x11   : > { %s127_s23 = sshll.u32 %s3258_s22, 4  ;;  %s31_s25 = sadd.s32 1, %s3252_s13  ;;  %s128_s23 = int_to_ptr.vmem [resolvable:$true] %s127_s23 }
  0x12   : > { %s4057_s21 = scalar_select %p3336_p8, 1, 0 }
  0x13   : > { %p3041_p9 = pneg %p3336_p8  ;;  %s3112_s28 = scalar_lea.hbm %s4018_s1, 2048 }
  0x14   : > { %p3113_p11 = scmp.ne.s32.totalorder %s4018_s1, %s3112_s28  ;;  %p3119_p3 = scmp.lt.u32.totalorder %s3112_s28, %s4018_s1 }
  0x15   : > { %p3344_p10 = pnand %p3041_p9, %p3316_p1 }
  0x17   : > { %p3114_p12 = pneg %p3344_p10 }
  0x19   : > { %p3115_p13 = pnand %p3114_p12, %p3113_p11 }
  0x1b   : > { %p3116_p0 = pneg %p3115_p13 }
  0x1d   : > { %p3121_p5 = pnand %p3119_p3, %p3116_p0 }
  0x1f   : > { %3124 = shalt.err (!%p3121_p5)
}
  0x20   : > { %s3125_s5 = scalar_lea.vmem %s128_s23, 2048  ;;  %p3133_p1 = scmp.lt.s32.totalorder %s128_s23, %s128_s23 }
  0x21   : > { %p3126_p7 = scmp.ne.s32.totalorder %s128_s23, %s3125_s5  ;;  %p3134_p4 = scmp.lt.s32.totalorder %s3125_s5, %s3125_s5 }
  0x23   : > { %p3128_p9 = pnand %p3126_p7, %p3114_p12  ;;  %p3135_p8 = por %p3134_p4, %p3133_p1 }
  0x25   : > { %p3129_p6 = pneg %p3128_p9 }
  0x27   : > { %p3136_p2 = pnand %p3135_p8, %p3129_p6 }
  0x29   : > { %3139 = shalt.err (!%p3136_p2)
}
  0x2a   : > { %s3259_s6 = smov 128   ;;  %s3260_s7 = smov 8  }
  0x2b   : > { %3044 = dma.hbm_to_vmem [thread:$0]  (!%p3344_p10), %s4018_s1, 2048, %s128_s23, [#allocation6], %s3259_s6, %s3259_s6, %s3260_s7  }
  0x2c   : > { %p33_p1 = scmp.ge.s32.totalorder %s31_s25, 4  ;;  %s42_s16 = sadd.s32 1, %s3244_s11 }
  0x2d   : > { %p49_p2 = scmp.ne.s32.totalorder %s3244_s11, %s3240_s10  ;;  %p50_p4 = scmp.eq.s32.totalorder %s3256_s14, 0 }
  0x2e   : > { %s4103_s25 = smov (%p33_p1, %s31_s25), 0  ;;  %p4060_p8 = scmp.ne.s32.totalorder %s4054_s18, 0 }
  0x2f   : > { %p3371_p6 = por %p50_p4, %p49_p2  ;;  %s37_s24 = ssub.s32 %s3252_s13, %s4103_s25 }
  0x30   : > { %p3377_p11 = por %p4060_p8, %p49_p2  ;;  %p3054_p12 = scmp.lt.s32.totalorder %s3256_s14, 4 }
  0x31   : > { %p40_p10 = scmp.eq.s32.totalorder %s37_s24, 0  ;;  %s141_s23 = sand.u32 1, %s3244_s11  }
  0x32   : > { %s1895_s27 = sshll.u32 %s141_s23, 6  ;;  %s1910_s29 = sshll.u32 %s3252_s13, 10 }
  0x33   : > { %s3386_s28 = scalar_select %p40_p10, %s3244_s11, %s42_s16  }
  0x34   : > { %s3392_s4 = scalar_lea.hbm %s4017_s0, %s1910_s29  ;;  %s145_s18 = scalar_lea.vmem [#allocation2], %s1895_s27 }
  0x35   : > { %s156_s5 = sshll.u32 %s145_s18, 4  ;;  %p3398_p13 = pnand %p3054_p12, %p3371_p6  ;;  %s3394_s5 = int_to_ptr.vmem [resolvable:$true] %s156_s5 }
  0x36   : > { %s3402_s7 = scalar_lea.sflag [#allocation3], %s141_s23  ;;  %s3140_s8 = scalar_lea.hbm %s3392_s4, 1024 }
  0x37   : > { %p3141_p0 = scmp.ne.s32.totalorder %s3392_s4, %s3140_s8  ;;  %p3142_p3 = pneg %p3398_p13 }
  0x38   : > { %s3145_s22 = scalar_lea.hbm %s4017_s0, 4096  ;;  %p3146_p9 = scmp.lt.u32.totalorder %s3392_s4, %s4017_s0 }
  0x39   : > { %p3143_p5 = pnand %p3142_p3, %p3141_p0  ;;  %p3147_p1 = scmp.lt.u32.totalorder %s3145_s22, %s3140_s8 }
  0x3a   : > { %p3149_p4 = scmp.lt.u32.totalorder %s3140_s8, %s3392_s4 }
  0x3b   : > { %p3144_p7 = pneg %p3143_p5  ;;  %p3148_p2 = por %p3147_p1, %p3146_p9 }
  0x3d   : > { %p3150_p6 = por %p3149_p4, %p3148_p2 }
  0x3f   : > { %p3151_p8 = pnand %p3150_p6, %p3144_p7 }
  0x41   : > { %3154 = shalt.err (!%p3151_p8)
}
  0x42   : > { %s3155_s23 = scalar_lea.vmem %s3394_s5, 1024  ;;  %s3261_s29 = smov [#allocation2]  }
  0x43   : > { %p3156_p12 = scmp.ne.s32.totalorder %s3394_s5, %s3155_s23  ;;  %s3160_s30 = sshll.u32 %s3261_s29, 4  ;;  %s3161_s30 = int_to_ptr.vmem [resolvable:$false] %s3160_s30 }
  0x44   : > { %s3162_s3 = scalar_lea.vmem %s3161_s30, 2048  ;;  %p3163_p5 = scmp.lt.s32.totalorder %s3394_s5, %s3161_s30 }
  0x45   : > { %p3158_p10 = pnand %p3156_p12, %p3142_p3  ;;  %p3164_p9 = scmp.lt.s32.totalorder %s3162_s3, %s3155_s23 }
  0x47   : > { %p3159_p0 = pneg %p3158_p10  ;;  %p3165_p1 = por %p3164_p9, %p3163_p5 }
  0x49   : > { %p3166_p2 = pnand %p3165_p1, %p3159_p0 }
  0x4b   : > { %3169 = shalt.err (!%p3166_p2)
}
  0x4c   : > { %s3262_s18 = smov 256   ;;  %s3263_s8 = smov 16  }
  0x4d   : > { %3048 = dma.hbm_to_vmem [thread:$0]  (!%p3398_p13), %s3392_s4, 1024, %s3394_s5, %s3402_s7, %s3262_s18, %s3262_s18, %s3263_s8  }
  0x4e   : > { %p4063_p3 = scmp.ne.s32.totalorder %s4057_s21, 0 }
  0x50   : > { %168 = sbr.rel (%p4063_p3) target bundleno = 523 (0x20b), region = 28 }
  0x57   : > { %s3433_s15 = sand.u32 1, %s3240_s10   ;;  %p4064_p7 = scmp.ne.s32.totalorder %s4055_s19, 0 }
  0x58   : > { %s1900_s16 = sshll.u32 %s3433_s15, 6  ;;  %s171_s22 = scalar_lea.sflag [#allocation3], %s3433_s15 }
  0x59   : > { %s3439_s24 = scalar_lea.vmem [#allocation2], %s1900_s16 }
  0x5a   : > { %3223 = dma.done.wait (%p4064_p7), %s171_s22, 1024  }
  0x5b   : > { %3225 = vsyncadd (%p4064_p7), %s171_s22, 4294966272  ;;  %p4065_p13 = scmp.ne.s32.totalorder %s4053_s17, 0 }
  0x5d   : > { %3227 = dma.done.wait (%p4065_p13), [#allocation6], 2048  }
  0x5e   : > { %3229 = vsyncadd (%p4065_p13), [#allocation6], 4294965248  ;;  %v204_v0 = vld [vmem:[#allocation5] sm:$0xff]  ;;  %v205_v1 = vld [vmem:[#allocation5 + $0x8] sm:$0xff]  ;;  %s198_s17 = scalar_lea.vmem [#allocation7], %s1900_s16  ;;  %s1912_s21 = sshll.u32 %s3248_s12, 10 }
  0x5f   : > { %v206_v2 = vld [vmem:[#allocation5 + $0x10] sm:$0xff]  ;;  %v225_v3 = vand.u32 4294901760, %v204_v0  ;;  %v228_v4 = vand.u32 4294901760, %v205_v1  ;;  %v207_v5 = vld [vmem:[#allocation5 + $0x18] sm:$0xff]  ;;  %v3449_v7 = vld [vmem:[#allocation5 + $0x20] sm:$0xff]  ;;  %s1793_s19 = sshll.u32 %s198_s17, 4  ;;  %s3969_s6 = scalar_lea.hbm %s4019_s2, %s1912_s21  ;;  %s3964_s19 = int_to_ptr.vmem [resolvable:$true] %s1793_s19 }
  0x60   : > { %v231_v6 = vand.u32 4294901760, %v206_v2  ;;  %v3451_v8 = vld [vmem:[#allocation5 + $0x28] sm:$0xff]  ;;  %v234_v9 = vand.u32 4294901760, %v207_v5  ;;  %v237_v11 = vand.u32 4294901760, %v3449_v7  ;;  %v3459_v14 = vld [vmem:[#allocation5 + $0x30] sm:$0xff]  ;;  %v3461_v15 = vld [vmem:[#allocation5 + $0x38] sm:$0xff] }
  0x61   : > { %v3453_v10 = vpack.c.bf16 %v228_v4, %v225_v3  ;;  %v240_v12 = vand.u32 4294901760, %v3451_v8  ;;  %v220_v16 = vld [vmem:[%s3439_s24] sm:$0xff]  ;;  %v998_v17 = vld [vmem:[%s3439_s24 + $0x8] sm:$0xff]  ;;  %v243_v21 = vand.u32 4294901760, %v3459_v14  ;;  %v246_v22 = vand.u32 4294901760, %v3461_v15  ;;  %v221_v25 = vld [vmem:[%s3439_s24 + $0x10] sm:$0xff] }
  0x62   : > { %v3457_v13 = vpack.c.bf16 %v234_v9, %v231_v6  ;;  %v3469_v18 = vld [vmem:[#allocation5 + $0x40] sm:$0xff]  ;;  %v3471_v19 = vand.u32 4294901760, %v220_v16  ;;  %v3483_v23 = vld [vmem:[#allocation5 + $0x48] sm:$0xff]  ;;  %v3485_v24 = vand.u32 4294901760, %v998_v17  ;;  %v999_v26 = vld [vmem:[%s3439_s24 + $0x18] sm:$0xff]  ;;  %v3493_v29 = vsub.f32 %v204_v0, %v225_v3  ;;  %s1777_s12 = scalar_lea.sflag [#allocation4], %s3433_s15 }
  0x63   : > { %2610 = vmatprep.subr.bf16.mxu0 %v3453_v10  ;;  %2802 = vmatprep.subr.bf16.mxu1 %v3453_v10  ;;  %v3479_v20 = vpack.c.bf16 %v240_v12, %v237_v11  ;;  %v249_v28 = vand.u32 4294901760, %v3469_v18  ;;  %v3495_v30 = vsub.f32 %v205_v1, %v228_v4  ;;  %v252_v32 = vand.u32 4294901760, %v3483_v23  ;;  %v3503_v33 = vld [vmem:[#allocation5 + $0x50] sm:$0xff]  ;;  %v3518_v38 = vld [vmem:[#allocation5 + $0x58] sm:$0xff]  ;;  %v3551_v52 = vld [vmem:[#allocation5 + $0x60] sm:$0xff]  ;;  %s3170_s7 = scalar_lea.vmem %s3964_s19, 1024 }
  0x64   : > { %2612 = vmatpush3.bf16.msra.mxu0 %v3453_v10  ;;  %2804 = vmatpush3.bf16.msra.mxu1 %v3453_v10  ;;  %v3490_v27 = vsub.f32 %v220_v16, %v3471_v19  ;;  %v3498_v31 = vsub.f32 %v998_v17, %v3485_v24  ;;  %v3506_v35 = vand.u32 4294901760, %v221_v25  ;;  %v3508_v36 = vand.u32 4294901760, %v999_v26  ;;  %v3555_v56 = vld [vmem:[#allocation5 + $0x68] sm:$0xff]  ;;  %v3557_v57 = vld [vmem:[#allocation5 + $0x70] sm:$0xff]  ;;  %v3559_v58 = vld [vmem:[#allocation5 + $0x78] sm:$0xff]  ;;  %p3171_p4 = scmp.ne.s32.totalorder %s3964_s19, %s3170_s7  ;;  %s3264_s27 = smov [#allocation7]  }
  0x65   : > { %2614 = vmatprep.subr.bf16.mxu0 %v3457_v13  ;;  %2806 = vmatprep.subr.bf16.mxu1 %v3457_v13  ;;  %4066 = vst [vmem:[#allocation11_spill] sm:$0xff] %v3479_v20  ;;  %v3516_v37 = vpack.c.bf16 %v246_v22, %v243_v21  ;;  %v3521_v40 = vsub.f32 %v206_v2, %v231_v6  ;;  %v255_v43 = vand.u32 4294901760, %v3503_v33  ;;  %v4037_v44 = vand.u32 4294901760, %v3493_v29  ;;  %s3174_s23 = sshll.u32 %s3264_s27, 4  ;;  %s3175_s23 = int_to_ptr.vmem [resolvable:$false] %s3174_s23 }
  0x66   : > { %v4027_v34 = vand.u32 4294901760, %v3490_v27  ;;  %v4026_v39 = vand.u32 4294901760, %v3498_v31  ;;  %v3523_v41 = vsub.f32 %v207_v5, %v234_v9  ;;  %v4036_v45 = vand.u32 4294901760, %v3495_v30  ;;  %p3172_p6 = pnand %p3171_p4, %p3377_p11  ;;  %s3176_s29 = scalar_lea.vmem %s3175_s23, 2048 }
  0x67   : > { %4067 = vst [vmem:[#allocation12_spill] sm:$0xff] %v3516_v37  ;;  %v258_v47 = vand.u32 4294901760, %v3518_v38  ;;  %v3538_v49 = vsub.f32 %v221_v25, %v3506_v35  ;;  %v3541_v50 = vsub.f32 %v999_v26, %v3508_v36  ;;  %v3549_v51 = vpack.c.bf16 %v252_v32, %v249_v28  ;;  %p3177_p12 = scmp.lt.s32.totalorder %s3964_s19, %s3175_s23  ;;  %p3178_p10 = scmp.lt.s32.totalorder %s3176_s29, %s3170_s7 }
  0x68   : > { %2616 = vmatpush3.bf16.msra.mxu0 %v3457_v13  ;;  %2808 = vmatpush3.bf16.msra.mxu1 %v3457_v13  ;;  %v308_v42 = vsub.f32 %v3490_v27, %v4027_v34  ;;  %v1086_v46 = vsub.f32 %v3498_v31, %v4026_v39  ;;  %v4033_v54 = vand.u32 4294901760, %v3521_v40  ;;  %v4032_v55 = vand.u32 4294901760, %v3523_v41  ;;  %p3173_p8 = pneg %p3172_p6 }
  0x69   : > { %2618 = vmatprep.subr.bf16.mxu0 %v3479_v20  ;;  %2810 = vmatprep.subr.bf16.mxu1 %v3479_v20  ;;  %4068 = vst [vmem:[#allocation13_spill] sm:$0xff] %v3549_v51  ;;  %v349_v59 = vsub.f32 %v3493_v29, %v4037_v44  ;;  %v356_v60 = vsub.f32 %v3495_v30, %v4036_v45  ;;  %v261_v63 = vand.u32 4294901760, %v3551_v52  ;;  %v4025_v0 = vand.u32 4294901760, %v3538_v49  ;;  %p3179_p0 = por %p3178_p10, %p3177_p12 }
  0x6a   : > { %v309_v48 = vand.u32 4294901760, %v308_v42  ;;  %v1087_v53 = vand.u32 4294901760, %v1086_v46  ;;  %v3570_v61 = vsub.f32 %v3449_v7, %v237_v11  ;;  %v3578_v62 = vpack.c.bf16 %v258_v47, %v255_v43  ;;  %v222_v46 = vld [vmem:[%s3439_s24 + $0x20] sm:$0xff] }
  0x6b   : > { %v4024_v1 = vand.u32 4294901760, %v3541_v50  ;;  %v264_v2 = vand.u32 4294901760, %v3555_v56  ;;  %v363_v3 = vsub.f32 %v3521_v40, %v4033_v54  ;;  %v370_v4 = vsub.f32 %v3523_v41, %v4032_v55  ;;  %p3180_p5 = pnand %p3179_p0, %p3173_p8 }
  0x6c   : > { %2620 = vmatpush3.bf16.msra.mxu0 %v3479_v20  ;;  %2812 = vmatpush3.bf16.msra.mxu1 %v3479_v20  ;;  %4069 = vst [vmem:[#allocation14_spill] sm:$0xff] %v3578_v62  ;;  %v3595_v5 = vsub.f32 %v3451_v8, %v240_v12  ;;  %v267_v6 = vand.u32 4294901760, %v3557_v57  ;;  %v270_v7 = vand.u32 4294901760, %v3559_v58  ;;  %v350_v9 = vand.u32 4294901760, %v349_v59 }
  0x6d   : > { %2622 = vmatprep.subr.bf16.mxu0 %v3516_v37  ;;  %2814 = vmatprep.subr.bf16.mxu1 %v3516_v37  ;;  %v357_v11 = vand.u32 4294901760, %v356_v60  ;;  %v4030_v16 = vand.u32 4294901760, %v3570_v61  ;;  %v3603_v17 = vsub.f32 %v3459_v14, %v243_v21  ;;  %v3610_v8 = vsub.f32 %v3538_v49, %v4025_v0 }
  0x6e   : > { %2185 = vmatprep.mubr.f32.mxu0 %v309_v48  ;;  %2413 = vmatprep.mubr.f32.mxu1 %v1087_v53  ;;  %v3615_v12 = vsub.f32 %v3541_v50, %v4024_v1  ;;  %v3620_v14 = vsub.f32 %v3461_v15, %v246_v22  ;;  %v3626_v21 = vpack.c.bf16 %v264_v2, %v261_v63  ;;  %v364_v25 = vand.u32 4294901760, %v363_v3  ;;  %v1000_v22 = vld [vmem:[%s3439_s24 + $0x28] sm:$0xff]  ;;  %v1001_v1 = vld [vmem:[%s3439_s24 + $0x38] sm:$0xff] }
  0x6f   : > { %v371_v26 = vand.u32 4294901760, %v370_v4  ;;  %v4028_v42 = vand.u32 4294901760, %v3595_v5  ;;  %v3633_v48 = vsub.f32 %v3469_v18, %v249_v28  ;;  %v3638_v15 = vsub.f32 %v3483_v23, %v252_v32  ;;  %v223_v28 = vld [vmem:[%s3439_s24 + $0x30] sm:$0xff] }
  0x70   : > { %2624 = vmatpush3.bf16.msra.mxu0 %v3516_v37  ;;  %2816 = vmatpush3.bf16.msra.mxu1 %v3516_v37  ;;  %4070 = vst [vmem:[#allocation15_spill] sm:$0xff] %v3626_v21  ;;  %v3643_v53 = vpack.c.bf16 %v270_v7, %v267_v6  ;;  %v3645_v59 = vpack.c.bf16 %v357_v11, %v350_v9  ;;  %v4029_v18 = vand.u32 4294901760, %v3603_v17  ;;  %v319_v23 = vand.u32 4294901760, %v3610_v8 }
  0x71   : > { %2626 = vmatprep.subr.bf16.mxu0 %v3549_v51  ;;  %2818 = vmatprep.subr.bf16.mxu1 %v3549_v51  ;;  %v377_v60 = vsub.f32 %v3570_v61, %v4030_v16  ;;  %v1097_v32 = vand.u32 4294901760, %v3615_v12  ;;  %v4031_v3 = vand.u32 4294901760, %v3620_v14  ;;  %v3657_v4 = vand.u32 4294901760, %v222_v46 }
  0x72   : > { %4071 = vst [vmem:[#allocation16_spill] sm:$0xff] %v3643_v53  ;;  %v3661_v9 = vpack.c.bf16 %v371_v26, %v364_v25  ;;  %v384_v11 = vsub.f32 %v3595_v5, %v4028_v42  ;;  %v3669_v8 = vsub.f32 %v3503_v33, %v255_v43  ;;  %v3671_v12 = vand.u32 4294901760, %v1000_v22 }
  0x73   : > { %v404_v0 = vand.u32 4294901760, %v3633_v48  ;;  %v411_v39 = vand.u32 4294901760, %v3638_v15  ;;  %v3677_v34 = vsub.f32 %v222_v46, %v3657_v4  ;;  %v3679_v25 = vand.u32 4294901760, %v223_v28 }
  0x74   : > { %2628 = vmatpush3.bf16.msra.mxu0 %v3549_v51  ;;  %2820 = vmatpush3.bf16.msra.mxu1 %v3549_v51  ;;  %v378_v26 = vand.u32 4294901760, %v377_v60  ;;  %v3684_v42 = vsub.f32 %v3603_v17, %v4029_v18  ;;  %v3689_v33 = vsub.f32 %v3518_v38, %v258_v47  ;;  %v3692_v43 = vsub.f32 %v1000_v22, %v3671_v12 }
  0x75   : > { %2630 = vmatprep.subr.bf16.mxu0 %v3578_v62  ;;  %2822 = vmatprep.subr.bf16.mxu1 %v3578_v62  ;;  %v3699_v46 = vsub.f32 %v3620_v14, %v4031_v3  ;;  %v4034_v60 = vand.u32 4294901760, %v3677_v34  ;;  %v3703_v18 = vsub.f32 %v223_v28, %v3679_v25  ;;  %v3705_v16 = vand.u32 4294901760, %v1001_v1 }
  0x76   : > { %v385_v38 = vand.u32 4294901760, %v384_v11  ;;  %v3712_v47 = vsub.f32 %v3551_v52, %v261_v63  ;;  %v3715_v22 = vsub.f32 %v3555_v56, %v264_v2  ;;  %v4035_v3 = vand.u32 4294901760, %v3692_v43 }
  0x77   : > { %v328_v28 = vsub.f32 %v3677_v34, %v4034_v60  ;;  %v3722_v55 = vsub.f32 %v3557_v57, %v267_v6  ;;  %v4042_v54 = vand.u32 4294901760, %v3703_v18  ;;  %v3726_v11 = vsub.f32 %v1001_v1, %v3705_v16 }
  0x78   : > { %2632 = vmatpush3.bf16.msra.mxu0 %v3578_v62  ;;  %2824 = vmatpush3.bf16.msra.mxu1 %v3578_v62  ;;  %v405_v52 = vsub.f32 %v3633_v48, %v404_v0  ;;  %v418_v63 = vand.u32 4294901760, %v3669_v8  ;;  %v3733_v56 = vsub.f32 %v3559_v58, %v270_v7  ;;  %v1106_v2 = vsub.f32 %v3692_v43, %v4035_v3 }
  0x79   : > { %2634 = vmatprep.subr.bf16.mxu0 %v3626_v21  ;;  %2826 = vmatprep.subr.bf16.mxu1 %v3626_v21  ;;  %v412_v57 = vsub.f32 %v3638_v15, %v411_v39  ;;  %v425_v1 = vand.u32 4294901760, %v3689_v33  ;;  %v338_v6 = vsub.f32 %v3703_v18, %v4042_v54  ;;  %v4049_v60 = vand.u32 4294901760, %v3726_v11 }
  0x7a   : > { %v2649_v58 = vpack.c.bf16 %v385_v38, %v378_v26  ;;  %v392_v7 = vand.u32 4294901760, %v3684_v42  ;;  %v432_v3 = vand.u32 4294901760, %v3712_v47  ;;  %v439_v45 = vand.u32 4294901760, %v3715_v22 }
  0x7b   : > { %v329_v44 = vand.u32 4294901760, %v328_v28  ;;  %v1116_v54 = vsub.f32 %v3726_v11, %v4049_v60  ;;  %v453_v62 = vand.u32 4294901760, %v3733_v56  ;;  %v339_v51 = vand.u32 4294901760, %v338_v6 }
  0x7c   : > { %2636 = vmatpush3.bf16.msra.mxu0 %v3626_v21  ;;  %2828 = vmatpush3.bf16.msra.mxu1 %v3626_v21  ;;  %v1107_v21 = vand.u32 4294901760, %v1106_v2  ;;  %v4072_v26 = vand.u32 4294901760, %v3493_v29  ;;  %v4073_v42 = vand.u32 4294901760, %v3495_v30  ;;  %v4075_v28 = vand.u32 4294901760, %v3521_v40 }
  0x7d   : > { %2638 = vmatprep.subr.bf16.mxu0 %v3643_v53  ;;  %2830 = vmatprep.subr.bf16.mxu1 %v3643_v53  ;;  %v4076_v37 = vand.u32 4294901760, %v3523_v41  ;;  %v4078_v6 = vand.u32 4294901760, %v3595_v5  ;;  %v3782_v20 = vpack.c.bf16 %v411_v39, %v404_v0  ;;  %v419_v39 = vsub.f32 %v3669_v8, %v418_v63 }
  0x7e   : > { %v3760_v38 = vpack.c.bf16 %v4073_v42, %v4072_v26  ;;  %v4079_v26 = vand.u32 4294901760, %v3603_v17  ;;  %v4080_v42 = vand.u32 4294901760, %v3620_v14  ;;  %v426_v0 = vsub.f32 %v3689_v33, %v425_v1 }
  0x7f   : > { %v3766_v2 = vpack.c.bf16 %v4076_v37, %v4075_v28  ;;  %v399_v37 = vand.u32 4294901760, %v3699_v46 }
  0x80   : > { %2640 = vmatpush3.bf16.msra.mxu0 %v3643_v53  ;;  %2832 = vmatpush3.bf16.msra.mxu1 %v3643_v53  ;;  %v446_v53 = vand.u32 4294901760, %v3722_v55  ;;  %4074 = vst [vmem:[#allocation17_spill] sm:$0xff] %v3760_v38  ;;  %v3780_v38 = vpack.c.bf16 %v4080_v42, %v4079_v26  ;;  %v2681_v42 = vpack.c.bf16 %v3595_v5, %v3570_v61  ;;  %v4082_v5 = vand.u32 4294901760, %v3490_v27 }
  0x81   : > { %2642 = vmatprep.subr.bf16.mxu0 %v3645_v59  ;;  %2834 = vmatprep.subr.bf16.mxu1 %v3645_v59  ;;  %v2653_v46 = vpack.c.bf16 %v399_v37, %v392_v7 }
  0x82   : > { %v3791_v28 = vpack.c.bf16 %v453_v62, %v446_v53  ;;  %v447_v7 = vsub.f32 %v3722_v55, %v446_v53  ;;  %v2673_v53 = vpack.c.bf16 %v3495_v30, %v3493_v29  ;;  %v2685_v29 = vpack.c.bf16 %v3620_v14, %v3603_v17  ;;  %v4084_v14 = vld [vmem:[#allocation12_spill] sm:$0xff] }
  0x83   : > { %2186 = vmatmul.mubr.f32.vlgmr.msra.gmra.mrb[0].mxu0 %v319_v23  ;;  %2414 = vmatmul.mubr.f32.vlgmr.msra.gmra.mrb[0].mxu1 %v1097_v32  ;;  %v1117_v23 = vand.u32 4294901760, %v1116_v54  ;;  %v4077_v32 = vand.u32 4294901760, %v3570_v61  ;;  %v3787_v54 = vpack.c.bf16 %v425_v1, %v418_v63  ;;  %v440_v63 = vsub.f32 %v3715_v22, %v439_v45 }
  0x84   : > { %2644 = vmatpush3.bf16.msra.mxu0 %v3645_v59  ;;  %2836 = vmatpush3.bf16.msra.mxu1 %v3645_v59  ;;  %v3789_v59 = vpack.c.bf16 %v439_v45, %v432_v3  ;;  %v448_v26 = vand.u32 4294901760, %v447_v7  ;;  %v2689_v30 = vpack.c.bf16 %v3638_v15, %v3633_v48  ;;  %v2701_v61 = vpack.c.bf16 %v3733_v56, %v3722_v55  ;;  %v4081_v55 = vld [vmem:[#allocation11_spill] sm:$0xff]  ;;  %v4085_v48 = vld [vmem:[#allocation13_spill] sm:$0xff]  ;;  %v4088_v15 = vld [vmem:[#allocation16_spill] sm:$0xff] }
  0x85   : > { %v3774_v60 = vpack.c.bf16 %v4078_v6, %v4077_v32  ;;  %2646 = vmatprep.subr.bf16.mxu0 %v3661_v9  ;;  %2838 = vmatprep.subr.bf16.mxu1 %v3661_v9  ;;  %v406_v32 = vand.u32 4294901760, %v405_v52  ;;  %v413_v6 = vand.u32 4294901760, %v412_v57  ;;  %v441_v57 = vand.u32 4294901760, %v440_v63 }
  0x86   : > { %2188 = vmatprep.mubr.f32.mxu0 %v329_v44  ;;  %2416 = vmatprep.mubr.f32.mxu1 %v1107_v21  ;;  %v420_v44 = vand.u32 4294901760, %v419_v39  ;;  %v4083_v17 = vand.u32 4294901760, %v3498_v31 }
  0x87   : > { %2189 = vmatmul.mubr.f32.gmra.mrb[2].mxu0 %v339_v51  ;;  %2417 = vmatmul.mubr.f32.gmra.mrb[2].mxu1 %v1117_v23  ;;  %v427_v51 = vand.u32 4294901760, %v426_v0  ;;  %v2657_v21 = vpack.c.bf16 %v413_v6, %v406_v32 }
  0x88   : > { %2648 = vmatpush3.bf16.msra.mxu0 %v3661_v9  ;;  %2840 = vmatpush3.bf16.msra.mxu1 %v3661_v9  ;;  %v433_v9 = vsub.f32 %v3712_v47, %v432_v3 }
  0x89   : > { %2650 = vmatprep.subr.bf16.mxu0 %v2649_v58  ;;  %2842 = vmatprep.subr.bf16.mxu1 %v2649_v58  ;;  %v2661_v1 = vpack.c.bf16 %v427_v51, %v420_v44 }
  0x8a   : > { %2223 = vmatprep.mubr.f32.mxu0 %v3471_v19  ;;  %2451 = vmatprep.mubr.f32.mxu1 %v3485_v24  ;;  %v434_v52 = vand.u32 4294901760, %v433_v9 }
  0x8c   : > { %2652 = vmatpush3.bf16.msra.mxu0 %v2649_v58  ;;  %2844 = vmatpush3.bf16.msra.mxu1 %v2649_v58  ;;  %v454_v58 = vsub.f32 %v3733_v56, %v453_v62  ;;  %v2665_v23 = vpack.c.bf16 %v441_v57, %v434_v52  ;;  %v2677_v62 = vpack.c.bf16 %v3523_v41, %v3521_v40  ;;  %v4093_v56 = vand.u32 4294901760, %v3692_v43 }
  0x8d   : > { %2654 = vmatprep.subr.bf16.mxu0 %v2653_v46  ;;  %2846 = vmatprep.subr.bf16.mxu1 %v2653_v46  ;;  %v2693_v40 = vpack.c.bf16 %v3689_v33, %v3669_v8  ;;  %v2697_v41 = vpack.c.bf16 %v3715_v22, %v3712_v47  ;;  %v4089_v8 = vld [vmem:[#allocation17_spill] sm:$0xff]  ;;  %v4090_v33 = vand.u32 4294901760, %v3538_v49  ;;  %v4091_v47 = vand.u32 4294901760, %v3541_v50 }
  0x8e   : > { %v455_v3 = vand.u32 4294901760, %v454_v58  ;;  %v4092_v22 = vand.u32 4294901760, %v3677_v34 }
  0x90   : > { %2656 = vmatpush3.bf16.msra.mxu0 %v2653_v46  ;;  %2848 = vmatpush3.bf16.msra.mxu1 %v2653_v46  ;;  %v2669_v45 = vpack.c.bf16 %v455_v3, %v448_v26 }
  0x91   : > { %2658 = vmatprep.subr.bf16.mxu0 %v2657_v21  ;;  %2850 = vmatprep.subr.bf16.mxu1 %v2657_v21 }
  0x94   : > { %2660 = vmatpush3.bf16.msra.mxu0 %v2657_v21  ;;  %2852 = vmatpush3.bf16.msra.mxu1 %v2657_v21 }
  0x95   : > { %2662 = vmatprep.subr.bf16.mxu0 %v2661_v1  ;;  %2854 = vmatprep.subr.bf16.mxu1 %v2661_v1 }
  0x98   : > { %2664 = vmatpush3.bf16.msra.mxu0 %v2661_v1  ;;  %2856 = vmatpush3.bf16.msra.mxu1 %v2661_v1 }
  0x99   : > { %2666 = vmatprep.subr.bf16.mxu0 %v2665_v23  ;;  %2858 = vmatprep.subr.bf16.mxu1 %v2665_v23 }
  0x9c   : > { %2668 = vmatpush3.bf16.msra.mxu0 %v2665_v23  ;;  %2860 = vmatpush3.bf16.msra.mxu1 %v2665_v23 }
  0x9d   : > { %2670 = vmatprep.subr.bf16.mxu0 %v2669_v45  ;;  %2862 = vmatprep.subr.bf16.mxu1 %v2669_v45 }
  0xa0   : > { %2672 = vmatpush3.bf16.msra.mxu0 %v2669_v45  ;;  %2864 = vmatpush3.bf16.msra.mxu1 %v2669_v45 }
  0xa1   : > { %2674 = vmatprep.subr.bf16.mxu0 %v2673_v53  ;;  %2866 = vmatprep.subr.bf16.mxu1 %v2673_v53 }
  0xa3   : > { %2224 = vmatmul.mubr.f32.vlgmr.msra.gmra.mrb[0].mxu0 %v3506_v35  ;;  %2452 = vmatmul.mubr.f32.vlgmr.msra.gmra.mrb[0].mxu1 %v3508_v36 }
  0xa4   : > { %2676 = vmatpush3.bf16.msra.mxu0 %v2673_v53  ;;  %2868 = vmatpush3.bf16.msra.mxu1 %v2673_v53 }
  0xa5   : > { %2678 = vmatprep.subr.bf16.mxu0 %v2677_v62  ;;  %2870 = vmatprep.subr.bf16.mxu1 %v2677_v62 }
  0xa6   : > { %2226 = vmatprep.mubr.f32.mxu0 %v3657_v4  ;;  %2454 = vmatprep.mubr.f32.mxu1 %v3671_v12 }
  0xa7   : > { %2227 = vmatmul.mubr.f32.gmra.mrb[2].mxu0 %v3679_v25  ;;  %2455 = vmatmul.mubr.f32.gmra.mrb[2].mxu1 %v3705_v16 }
  0xa8   : > { %2680 = vmatpush3.bf16.msra.mxu0 %v2677_v62  ;;  %2872 = vmatpush3.bf16.msra.mxu1 %v2677_v62 }
  0xa9   : > { %2682 = vmatprep.subr.bf16.mxu0 %v2681_v42  ;;  %2874 = vmatprep.subr.bf16.mxu1 %v2681_v42 }
  0xaa   : > { %2261 = vmatprep.mubr.f32.mxu0 %v3490_v27  ;;  %2489 = vmatprep.mubr.f32.mxu1 %v3498_v31  ;;  %v4086_v27 = vld [vmem:[#allocation14_spill] sm:$0xff]  ;;  %v4087_v31 = vld [vmem:[#allocation15_spill] sm:$0xff] }
  0xac   : > { %2684 = vmatpush3.bf16.msra.mxu0 %v2681_v42  ;;  %2876 = vmatpush3.bf16.msra.mxu1 %v2681_v42 }
  0xad   : > { %2686 = vmatprep.subr.bf16.mxu0 %v2685_v29  ;;  %2878 = vmatprep.subr.bf16.mxu1 %v2685_v29 }
  0xb0   : > { %2688 = vmatpush3.bf16.msra.mxu0 %v2685_v29  ;;  %2880 = vmatpush3.bf16.msra.mxu1 %v2685_v29 }
  0xb1   : > { %2690 = vmatprep.subr.bf16.mxu0 %v2689_v30  ;;  %2882 = vmatprep.subr.bf16.mxu1 %v2689_v30 }
  0xb4   : > { %2692 = vmatpush3.bf16.msra.mxu0 %v2689_v30  ;;  %2884 = vmatpush3.bf16.msra.mxu1 %v2689_v30 }
  0xb5   : > { %2694 = vmatprep.subr.bf16.mxu0 %v2693_v40  ;;  %2886 = vmatprep.subr.bf16.mxu1 %v2693_v40 }
  0xb8   : > { %2696 = vmatpush3.bf16.msra.mxu0 %v2693_v40  ;;  %2888 = vmatpush3.bf16.msra.mxu1 %v2693_v40 }
  0xb9   : > { %2698 = vmatprep.subr.bf16.mxu0 %v2697_v41  ;;  %2890 = vmatprep.subr.bf16.mxu1 %v2697_v41 }
  0xbc   : > { %2700 = vmatpush3.bf16.msra.mxu0 %v2697_v41  ;;  %2892 = vmatpush3.bf16.msra.mxu1 %v2697_v41 }
  0xbd   : > { %2702 = vmatprep.subr.bf16.mxu0 %v2701_v61  ;;  %2894 = vmatprep.subr.bf16.mxu1 %v2701_v61 }
  0xc0   : > { %2704 = vmatpush3.bf16.msra.mxu0 %v2701_v61  ;;  %2896 = vmatpush3.bf16.msra.mxu1 %v2701_v61 }
  0xc1   : > { %2706 = vmatprep.subr.bf16.mxu0 %v3453_v10  ;;  %2898 = vmatprep.subr.bf16.mxu1 %v3453_v10 }
  0xc3   : > { %2262 = vmatmul.mubr.f32.vlgmr.msra.gmra.mrb[0].mxu0 %v3538_v49  ;;  %2490 = vmatmul.mubr.f32.vlgmr.msra.gmra.mrb[0].mxu1 %v3541_v50  ;;  %v4094_v49 = vand.u32 4294901760, %v3703_v18  ;;  %v4095_v50 = vand.u32 4294901760, %v3726_v11 }
  0xc4   : > { %2708 = vmatpush3.bf16.msra.mxu0 %v3453_v10  ;;  %2900 = vmatpush3.bf16.msra.mxu1 %v3453_v10 }
  0xc5   : > { %2710 = vmatprep.subr.bf16.mxu0 %v3457_v13  ;;  %2902 = vmatprep.subr.bf16.mxu1 %v3457_v13 }
  0xc6   : > { %2264 = vmatprep.mubr.f32.mxu0 %v3677_v34  ;;  %2492 = vmatprep.mubr.f32.mxu1 %v3692_v43 }
  0xc7   : > { %2265 = vmatmul.mubr.f32.gmra.mrb[2].mxu0 %v3703_v18  ;;  %2493 = vmatmul.mubr.f32.gmra.mrb[2].mxu1 %v3726_v11 }
  0xc8   : > { %2712 = vmatpush3.bf16.msra.mxu0 %v3457_v13  ;;  %2904 = vmatpush3.bf16.msra.mxu1 %v3457_v13 }
  0xc9   : > { %2714 = vmatprep.subr.bf16.mxu0 %v4081_v55  ;;  %2906 = vmatprep.subr.bf16.mxu1 %v4081_v55 }
  0xca   : > { %2299 = vmatprep.mubr.f32.mxu0 %v4082_v5  ;;  %2527 = vmatprep.mubr.f32.mxu1 %v4083_v17 }
  0xcc   : > { %2716 = vmatpush3.bf16.msra.mxu0 %v4081_v55  ;;  %2908 = vmatpush3.bf16.msra.mxu1 %v4081_v55 }
  0xcd   : > { %2718 = vmatprep.subr.bf16.mxu0 %v4084_v14  ;;  %2910 = vmatprep.subr.bf16.mxu1 %v4084_v14 }
  0xd0   : > { %2720 = vmatpush3.bf16.msra.mxu0 %v4084_v14  ;;  %2912 = vmatpush3.bf16.msra.mxu1 %v4084_v14 }
  0xd1   : > { %2722 = vmatprep.subr.bf16.mxu0 %v4085_v48  ;;  %2914 = vmatprep.subr.bf16.mxu1 %v4085_v48 }
  0xd4   : > { %2724 = vmatpush3.bf16.msra.mxu0 %v4085_v48  ;;  %2916 = vmatpush3.bf16.msra.mxu1 %v4085_v48 }
  0xd5   : > { %2726 = vmatprep.subr.bf16.mxu0 %v4086_v27  ;;  %2918 = vmatprep.subr.bf16.mxu1 %v4086_v27 }
  0xd8   : > { %2728 = vmatpush3.bf16.msra.mxu0 %v4086_v27  ;;  %2920 = vmatpush3.bf16.msra.mxu1 %v4086_v27 }
  0xd9   : > { %2730 = vmatprep.subr.bf16.mxu0 %v4087_v31  ;;  %2922 = vmatprep.subr.bf16.mxu1 %v4087_v31 }
  0xdc   : > { %2732 = vmatpush3.bf16.msra.mxu0 %v4087_v31  ;;  %2924 = vmatpush3.bf16.msra.mxu1 %v4087_v31 }
  0xdd   : > { %2734 = vmatprep.subr.bf16.mxu0 %v4088_v15  ;;  %2926 = vmatprep.subr.bf16.mxu1 %v4088_v15 }
  0xe0   : > { %2736 = vmatpush3.bf16.msra.mxu0 %v4088_v15  ;;  %2928 = vmatpush3.bf16.msra.mxu1 %v4088_v15 }
  0xe1   : > { %2738 = vmatprep.subr.bf16.mxu0 %v4089_v8  ;;  %2930 = vmatprep.subr.bf16.mxu1 %v4089_v8 }
  0xe3   : > { %2300 = vmatmul.mubr.f32.vlgmr.msra.gmra.mrb[0].mxu0 %v4090_v33  ;;  %2528 = vmatmul.mubr.f32.vlgmr.msra.gmra.mrb[0].mxu1 %v4091_v47 }
  0xe4   : > { %2740 = vmatpush3.bf16.msra.mxu0 %v4089_v8  ;;  %2932 = vmatpush3.bf16.msra.mxu1 %v4089_v8 }
  0xe5   : > { %2742 = vmatprep.subr.bf16.mxu0 %v3766_v2  ;;  %2934 = vmatprep.subr.bf16.mxu1 %v3766_v2 }
  0xe6   : > { %2302 = vmatprep.mubr.f32.mxu0 %v4092_v22  ;;  %2530 = vmatprep.mubr.f32.mxu1 %v4093_v56 }
  0xe7   : > { %2303 = vmatmul.mubr.f32.gmra.mrb[2].mxu0 %v4094_v49  ;;  %2531 = vmatmul.mubr.f32.gmra.mrb[2].mxu1 %v4095_v50 }
  0xe8   : > { %2744 = vmatpush3.bf16.msra.mxu0 %v3766_v2  ;;  %2936 = vmatpush3.bf16.msra.mxu1 %v3766_v2 }
  0xe9   : > { %2746 = vmatprep.subr.bf16.mxu0 %v3774_v60  ;;  %2938 = vmatprep.subr.bf16.mxu1 %v3774_v60 }
  0xea   : > { %2337 = vmatprep.mubr.f32.mxu0 %v3471_v19  ;;  %2565 = vmatprep.mubr.f32.mxu1 %v3485_v24 }
  0xec   : > { %2748 = vmatpush3.bf16.msra.mxu0 %v3774_v60  ;;  %2940 = vmatpush3.bf16.msra.mxu1 %v3774_v60 }
  0xed   : > { %2750 = vmatprep.subr.bf16.mxu0 %v3780_v38  ;;  %2942 = vmatprep.subr.bf16.mxu1 %v3780_v38 }
  0xf0   : > { %2752 = vmatpush3.bf16.msra.mxu0 %v3780_v38  ;;  %2944 = vmatpush3.bf16.msra.mxu1 %v3780_v38 }
  0xf1   : > { %2754 = vmatprep.subr.bf16.mxu0 %v3782_v20  ;;  %2946 = vmatprep.subr.bf16.mxu1 %v3782_v20 }
  0xf4   : > { %2756 = vmatpush3.bf16.msra.mxu0 %v3782_v20  ;;  %2948 = vmatpush3.bf16.msra.mxu1 %v3782_v20 }
  0xf5   : > { %2758 = vmatprep.subr.bf16.mxu0 %v3787_v54  ;;  %2950 = vmatprep.subr.bf16.mxu1 %v3787_v54 }
  0xf8   : > { %2760 = vmatpush3.bf16.msra.mxu0 %v3787_v54  ;;  %2952 = vmatpush3.bf16.msra.mxu1 %v3787_v54 }
  0xf9   : > { %2762 = vmatprep.subr.bf16.mxu0 %v3789_v59  ;;  %2954 = vmatprep.subr.bf16.mxu1 %v3789_v59 }
  0xfc   : > { %2764 = vmatpush3.bf16.msra.mxu0 %v3789_v59  ;;  %2956 = vmatpush3.bf16.msra.mxu1 %v3789_v59 }
  0xfd   : > { %2766 = vmatprep.subr.bf16.mxu0 %v3791_v28  ;;  %2958 = vmatprep.subr.bf16.mxu1 %v3791_v28 }
 0x100   : > { %2768 = vmatpush3.bf16.msra.mxu0 %v3791_v28  ;;  %2960 = vmatpush3.bf16.msra.mxu1 %v3791_v28 }
 0x101   : > { %2770 = vmatprep.subr.bf16.mxu0 %v3453_v10  ;;  %2962 = vmatprep.subr.bf16.mxu1 %v3453_v10 }
 0x103   : > { %2338 = vmatmul.mubr.f32.vlgmr.msra.gmra.mrb[0].mxu0 %v3506_v35  ;;  %2566 = vmatmul.mubr.f32.vlgmr.msra.gmra.mrb[0].mxu1 %v3508_v36 }
 0x104   : > { %2772 = vmatpush3.bf16.msra.mxu0 %v3453_v10  ;;  %2964 = vmatpush3.bf16.msra.mxu1 %v3453_v10 }
 0x105   : > { %2774 = vmatprep.subr.bf16.mxu0 %v3457_v13  ;;  %2966 = vmatprep.subr.bf16.mxu1 %v3457_v13 }
 0x106   : > { %2340 = vmatprep.mubr.f32.mxu0 %v3657_v4  ;;  %2568 = vmatprep.mubr.f32.mxu1 %v3671_v12 }
 0x107   : > { %2341 = vmatmul.mubr.f32.gmra.mrb[2].mxu0 %v3679_v25  ;;  %2569 = vmatmul.mubr.f32.gmra.mrb[2].mxu1 %v3705_v16 }
 0x108   : > { %2776 = vmatpush3.bf16.msra.mxu0 %v3457_v13  ;;  %2968 = vmatpush3.bf16.msra.mxu1 %v3457_v13 }
 0x109   : > { %2778 = vmatprep.subr.bf16.mxu0 %v4081_v55  ;;  %2970 = vmatprep.subr.bf16.mxu1 %v4081_v55 }
 0x10a   : > { %2375 = vmatprep.mubr.f32.mxu0 %v3471_v19  ;;  %2603 = vmatprep.mubr.f32.mxu1 %v3485_v24 }
 0x10c   : > { %2780 = vmatpush3.bf16.msra.mxu0 %v4081_v55  ;;  %2972 = vmatpush3.bf16.msra.mxu1 %v4081_v55 }
 0x10d   : > { %2782 = vmatprep.subr.bf16.mxu0 %v4084_v14  ;;  %2974 = vmatprep.subr.bf16.mxu1 %v4084_v14 }
 0x110   : > { %2784 = vmatpush3.bf16.msra.mxu0 %v4084_v14  ;;  %2976 = vmatpush3.bf16.msra.mxu1 %v4084_v14 }
 0x111   : > { %2786 = vmatprep.subr.bf16.mxu0 %v4085_v48  ;;  %2978 = vmatprep.subr.bf16.mxu1 %v4085_v48 }
 0x114   : > { %2788 = vmatpush3.bf16.msra.mxu0 %v4085_v48  ;;  %2980 = vmatpush3.bf16.msra.mxu1 %v4085_v48 }
 0x115   : > { %2790 = vmatprep.subr.bf16.mxu0 %v4086_v27  ;;  %2982 = vmatprep.subr.bf16.mxu1 %v4086_v27 }
 0x118   : > { %2792 = vmatpush3.bf16.msra.mxu0 %v4086_v27  ;;  %2984 = vmatpush3.bf16.msra.mxu1 %v4086_v27 }
 0x119   : > { %2794 = vmatprep.subr.bf16.mxu0 %v4087_v31  ;;  %2986 = vmatprep.subr.bf16.mxu1 %v4087_v31 }
 0x11c   : > { %2796 = vmatpush3.bf16.msra.mxu0 %v4087_v31  ;;  %2988 = vmatpush3.bf16.msra.mxu1 %v4087_v31 }
 0x11d   : > { %2798 = vmatprep.subr.bf16.mxu0 %v4088_v15  ;;  %2990 = vmatprep.subr.bf16.mxu1 %v4088_v15 }
 0x120   : > { %2800 = vmatpush3.bf16.msra.mxu0 %v4088_v15  ;;  %2992 = vmatpush3.bf16.msra.mxu1 %v4088_v15 }
 0x123   : > { %2376 = vmatmul.mubr.f32.vlgmr.msra.gmra.mrb[0].mxu0 %v3506_v35  ;;  %2604 = vmatmul.mubr.f32.vlgmr.msra.gmra.mrb[0].mxu1 %v3508_v36 }
 0x124   : > { %2378 = vmatprep.mubr.f32.mxu0 %v3657_v4  ;;  %2606 = vmatprep.mubr.f32.mxu1 %v3671_v12 }
 0x127   : > { %2379 = vmatmul.mubr.f32.gmra.mrb[2].mxu0 %v3679_v25  ;;  %2607 = vmatmul.mubr.f32.gmra.mrb[2].mxu1 %v3705_v16 }
 0x1f6   : > { %v2377_v10 = vpop.f32.mrb[0].mxu0  ;;  %v2605_v13 = vpop.f32.mrb[0].mxu1 }
 0x1f7   : > { %995 = vst [vmem:[%s198_s17 + $0x18] sm:$0xff] %v2377_v10  ;;  %1773 = vst [vmem:[%s198_s17 + $0x10] sm:$0xff] %v2605_v13  ;;  %v972_v19 = vpop.f32.mrb[1].mxu0  ;;  %v1750_v20 = vpop.f32.mrb[1].mxu1 }
 0x1f8   : > { %994 = vst [vmem:[%s198_s17 + $0x8] sm:$0xff] %v972_v19  ;;  %1772 = vst [vmem:[%s198_s17] sm:$0xff] %v1750_v20 }
 0x1fa   : > { %v2380_v24 = vpop.f32.mrb[2].mxu0  ;;  %v2608_v34 = vpop.f32.mrb[2].mxu1 }
 0x1fb   : > { %997 = vst [vmem:[%s198_s17 + $0x38] sm:$0xff] %v2380_v24  ;;  %1775 = vst [vmem:[%s198_s17 + $0x30] sm:$0xff] %v2608_v34  ;;  %v984_v35 = vpop.f32.mrb[3].mxu0  ;;  %v1762_v36 = vpop.f32.mrb[3].mxu1 }
 0x1fc   : > { %996 = vst [vmem:[%s198_s17 + $0x28] sm:$0xff] %v984_v35  ;;  %1774 = vst [vmem:[%s198_s17 + $0x20] sm:$0xff] %v1762_v36 }
 0x1fd   : > { %3183 = shalt.err (!%p3180_p5)
}
 0x1fe   : > { %s3184_s30 = scalar_lea.hbm %s3969_s6, 1024  ;;  %s3188_s8 = scalar_lea.hbm %s4019_s2, 4096 }
 0x1ff   : > { %p3185_p9 = scmp.ne.s32.totalorder %s3969_s6, %s3184_s30  ;;  %p3189_p3 = scmp.lt.u32.totalorder %s3969_s6, %s4019_s2 }
 0x200   : > { %p3190_p7 = scmp.lt.u32.totalorder %s3188_s8, %s3184_s30  ;;  %p3192_p4 = scmp.lt.u32.totalorder %s3184_s30, %s3969_s6 }
 0x201   : > { %p3186_p1 = pnand %p3185_p9, %p3377_p11 }
 0x202   : > { %p3191_p13 = por %p3190_p7, %p3189_p3 }
 0x203   : > { %p3187_p2 = pneg %p3186_p1 }
 0x204   : > { %p3193_p6 = por %p3192_p4, %p3191_p13 }
 0x206   : > { %p3194_p8 = pnand %p3193_p6, %p3187_p2 }
 0x208   : > { %3197 = shalt.err (!%p3194_p8)
}
 0x209   : > { %s3265_s24 = smov 256   ;;  %s3266_s17 = smov 16  }
 0x20a   : > { %3039 = dma.vmem_to_hbm [thread:$0]  (%p3377_p11), %s3964_s19, 1024, %s3969_s6, %s1777_s12, %s3265_s24, %s3265_s24, %s3266_s17  }
 0x20b PF: > { %p3056_p12 = scmp.ge.s32.totalorder %s3256_s14, 2  ;;  %s1808_s21 = sand.u32 1, %s3236_s9  }
 0x20c   : > { %p4096_p10 = scmp.ne.s32.totalorder %s4056_s20, 0  ;;  %s1809_s4 = scalar_lea.sflag [#allocation4], %s1808_s21 }
 0x20e   : > { %p3050_p0 = pnand %p3056_p12, %p4096_p10 }
 0x210   : > { %3231 = dma.done.wait (!%p3050_p0), %s1809_s4, 1024  }
 0x211   : > { %3233 = vsyncadd (!%p3050_p0), %s1809_s4, 4294966272  ;;  %s19_s14 = sadd.s32 1, %s3256_s14   ;;  %s4097_s9 = smov %s3240_s10 }
 0x212   : > { %p16_p5 = scmp.ge.s32.totalorder %s19_s14, 6   ;;  %s4098_s10 = smov %s3244_s11 }
 0x213   : > { %s4099_s11 = smov %s3386_s28  ;;  %s4100_s12 = smov %s3252_s13 }
 0x214   : > { %s4101_s13 = smov %s4103_s25  ;;  %18 = sbr.rel (!%p16_p5) target bundleno = 7 (0x7), region = 77 }
 0x21b   :  { %1814 = vsyncpa [#allocation3], 1 }
 0x21c   :  { %1816 = vsyncpa [#allocation3 + $0x1], 1 }
 0x21d   :  { %1817 = vsyncpa [#allocation6], 1 }
 0x21e   :  { %1818 = vsyncpa [#allocation4], 1 }
 0x21f   :  { %1820 = vsyncpa [#allocation4 + $0x1], 1 }

</bundles_post_ra>
